<compile_context>
chip_gen: v5e
topology: v5e:2x2
jax: 0.10.0
libtpu: 0.0.40
codegen_flags: <defaults>
</compile_context>

<pallas_src>
import functools

import jax
import jax.numpy as jnp
from jax.experimental import pallas as pl
from jax.experimental.pallas import tpu as pltpu


def _round_up(x, m):
    return ((x + m - 1) // m) * m


def _itemsize(a):
    return jnp.dtype(a.dtype).itemsize


def _tpu_params():
    """(vmem_capacity_bytes, num_tensorcores, preferred_mxu_M). Defensive."""
    kind = ""
    try:
        kind = jax.devices()[0].device_kind.lower()
    except Exception:
        pass
    is_v7 = "v7" in kind
    wide_mxu = ("v6" in kind) or is_v7            # 256x256 MXU
    vmem = None
    try:
        info = pltpu.get_tpu_info()
        cap = int(getattr(info, "vmem_capacity_bytes", 0))
        if cap > 0:
            vmem = cap
    except Exception:
        pass
    if vmem is None:
        vmem = (64 << 20) if is_v7 else (128 << 20)
    num_tc = 2 if is_v7 else 1
    mxu_m = 256 if wide_mxu else 128
    return vmem, num_tc, mxu_m


def _cast_for_mxu(a, w_dtype):
    # Put both matmul operands in the (narrower) weight dtype so bf16 weights
    # hit the bf16-native MXU path; no-op for f32 weights.
    if jnp.dtype(w_dtype).itemsize < jnp.dtype(a.dtype).itemsize:
        return a.astype(w_dtype)
    return a


# ---------------------------------------------------------------------------
# Kernels
# ---------------------------------------------------------------------------
def adapter_kernel(x_ref, w1_ref, b1_ref, w2_ref, b2_ref, g_ref, bt_ref, o_ref,
                   *, eps):
    """Weights fully VMEM-resident; one grid axis over the batch."""
    x = x_ref[...]

    h = jnp.dot(_cast_for_mxu(x, w1_ref.dtype), w1_ref[...],
                preferred_element_type=jnp.float32)
    h = jnp.maximum(h + b1_ref[...], 0.0)

    y = jnp.dot(_cast_for_mxu(h, w2_ref.dtype), w2_ref[...],
                preferred_element_type=jnp.float32)
    y = y + b2_ref[...]

    z = x.astype(jnp.float32) + y
    mean = jnp.mean(z, axis=-1, keepdims=True)
    zc = z - mean
    var = jnp.mean(zc * zc, axis=-1, keepdims=True)
    zn = zc * jax.lax.rsqrt(var + eps)
    o_ref[...] = (zn * g_ref[...] + bt_ref[...]).astype(o_ref.dtype)


def adapter_kernel_htiled(x_ref, w1_ref, b1_ref, w2_ref, b2_ref, g_ref, bt_ref,
                          o_ref, acc_ref, *, eps):
    """Hidden dim tiled over grid axis 1 (reduction); f32 accumulator scratch."""
    k = pl.program_id(1)

    @pl.when(k == 0)
    def _():
        acc_ref[...] = jnp.zeros_like(acc_ref)

    x = x_ref[...]
    h = jnp.dot(_cast_for_mxu(x, w1_ref.dtype), w1_ref[...],
                preferred_element_type=jnp.float32)
    h = jnp.maximum(h + b1_ref[...], 0.0)           # ReLU is elementwise in H,
    acc_ref[...] += jnp.dot(_cast_for_mxu(h, w2_ref.dtype), w2_ref[...],
                            preferred_element_type=jnp.float32)  # so partial sums are exact.

    @pl.when(k == pl.num_programs(1) - 1)
    def _():
        y = acc_ref[...] + b2_ref[...]
        z = x.astype(jnp.float32) + y
        mean = jnp.mean(z, axis=-1, keepdims=True)
        zc = z - mean
        var = jnp.mean(zc * zc, axis=-1, keepdims=True)
        zn = zc * jax.lax.rsqrt(var + eps)
        o_ref[...] = (zn * g_ref[...] + bt_ref[...]).astype(o_ref.dtype)


# ---------------------------------------------------------------------------
# Wrapper
# ---------------------------------------------------------------------------
def adapter_forward(x, w1, b1, w2, b2, gamma, beta, *,
                    eps=1e-5, block_m=None, h_block=None,
                    force_h_tiling=False, x_buffers=2):
    """x: (B, D); w1: (D, H); b1: (H,); w2: (H, D); b2: (D,); gamma/beta: (D,)."""
    B, D = x.shape
    H = w1.shape[1]

    vmem_cap, num_tc, mxu_m = _tpu_params()
    budget = int(0.85 * vmem_cap)          # leave headroom for compiler scratch

    isz_x, isz_w1, isz_w2 = _itemsize(x), _itemsize(w1), _itemsize(w2)

    # --- batch tile ---------------------------------------------------------
    pref_bm = block_m if block_m is not None else mxu_m
    bm = min(pref_bm, _round_up(B, 8))
    # Split into >= num_tc grid steps only when there are multiple TensorCores
    # (v7x); on single-TC chips the grid is a sequential loop and the split is
    # pure overhead.
    if num_tc >= 2 and B > 8 and pl.cdiv(_round_up(B, 8), bm) < num_tc:
        bm = max(8, _round_up(pl.cdiv(B, num_tc), 8))

    def resident_vmem(bm_):
        return (x_buffers * bm_ * D * isz_x          # x tiles
                + 2 * bm_ * D * isz_x                # out tiles
                + D * H * isz_w1 + H * D * isz_w2    # resident weights
                + (H + 3 * D + 64) * 4               # biases / gamma / beta
                + bm_ * H * 4 + 4 * bm_ * D * 4)     # f32 intermediates

    def htiled_vmem(bm_, th_):
        return (x_buffers * bm_ * D * isz_x
                + 2 * bm_ * D * isz_x
                + 2 * D * th_ * isz_w1 + 2 * th_ * D * isz_w2 + 2 * th_ * 4
                + bm_ * D * 4                        # f32 accumulator scratch
                + bm_ * th_ * 4 + 3 * bm_ * D * 4
                + 3 * D * 4)

    weight_bytes = D * H * isz_w1 + H * D * isz_w2
    use_h_tiling = force_h_tiling or weight_bytes > budget // 2
    if not use_h_tiling:
        while resident_vmem(bm) > budget and bm > 8:
            bm = max(8, _round_up(bm // 2, 8))
        if resident_vmem(bm) > budget:
            use_h_tiling = True

    # --- pad batch to a tile multiple ---------------------------------------
    Bp = _round_up(B, bm)
    x_in = jnp.pad(x, ((0, Bp - B), (0, 0))) if Bp != B else x

    # --- parameters: (1, N) rows, pre-cast to f32 on the host ---------------
    b1r = b1.reshape(1, H).astype(jnp.float32)
    b2r = b2.reshape(1, D).astype(jnp.float32)
    gr = gamma.reshape(1, D).astype(jnp.float32)
    br = beta.reshape(1, D).astype(jnp.float32)

    single = pl.Buffered(1)                # grid-invariant: one VMEM copy only
    xmode = pl.Buffered(x_buffers)
    # TODO(synk): if D % 128 != 0 the output store path uses masked vst; a
    # lane-padded feature dim would need LN mean/var corrections, so it is not
    # applied here.

    if not use_h_tiling:
        # ---- fast path: weights fully resident ------------------------------
        vmem_needed = resident_vmem(bm)
        vmem_limit = int(min(budget, max(int(vmem_needed * 1.4), 32 << 20)))
        kernel = functools.partial(adapter_kernel, eps=eps)
        out = pl.pallas_call(
            kernel,
            out_shape=jax.ShapeDtypeStruct((Bp, D), x.dtype),
            grid_spec=pltpu.PrefetchScalarGridSpec(
                num_scalar_prefetch=0,
                grid=(Bp // bm,),
                in_specs=[
                    pl.BlockSpec((bm, D), lambda i: (i, 0), pipeline_mode=xmode),
                    pl.BlockSpec((D, H), lambda i: (0, 0), pipeline_mode=single),
                    pl.BlockSpec((1, H), lambda i: (0, 0), pipeline_mode=single),
                    pl.BlockSpec((H, D), lambda i: (0, 0), pipeline_mode=single),
                    pl.BlockSpec((1, D), lambda i: (0, 0), pipeline_mode=single),
                    pl.BlockSpec((1, D), lambda i: (0, 0), pipeline_mode=single),
                    pl.BlockSpec((1, D), lambda i: (0, 0), pipeline_mode=single),
                ],
                out_specs=pl.BlockSpec((bm, D), lambda i: (i, 0)),
            ),
            compiler_params=pltpu.CompilerParams(
                dimension_semantics=("parallel",),
                vmem_limit_bytes=vmem_limit,
            ),
        )(x_in, w1, b1r, w2, b2r, gr, br)
    else:
        # ---- H-tiled fallback: second (reduction) grid axis over hidden dim -
        Hpad = _round_up(H, 128)
        tH = min(h_block if h_block is not None else 512, Hpad)
        tH = _round_up(tH, 128)
        while htiled_vmem(bm, tH) > budget and tH > 128:
            tH = max(128, _round_up(tH // 2, 128))
        while htiled_vmem(bm, tH) > budget and bm > 8:
            bm = max(8, _round_up(bm // 2, 8))
            Bp = _round_up(B, bm)
            x_in = jnp.pad(x, ((0, Bp - B), (0, 0))) if Bp != B else x
        Hp = _round_up(Hpad, tH)

        if Hp != H:
            # Zero-padded hidden units contribute ReLU(0)=0 through zero W2 rows.
            w1 = jnp.pad(w1, ((0, 0), (0, Hp - H)))
            w2 = jnp.pad(w2, ((0, Hp - H), (0, 0)))
            b1r = jnp.pad(b1r, ((0, 0), (0, Hp - H)))

        vmem_needed = htiled_vmem(bm, tH)
        vmem_limit = int(min(budget, max(int(vmem_needed * 1.4), 32 << 20)))
        kernel = functools.partial(adapter_kernel_htiled, eps=eps)
        out = pl.pallas_call(
            kernel,
            out_shape=jax.ShapeDtypeStruct((Bp, D), x.dtype),
            grid_spec=pltpu.PrefetchScalarGridSpec(
                num_scalar_prefetch=0,
                grid=(Bp // bm, Hp // tH),
                in_specs=[
                    pl.BlockSpec((bm, D), lambda i, k: (i, 0), pipeline_mode=xmode),
                    pl.BlockSpec((D, tH), lambda i, k: (0, k)),
                    pl.BlockSpec((1, tH), lambda i, k: (0, k)),
                    pl.BlockSpec((tH, D), lambda i, k: (k, 0)),
                    pl.BlockSpec((1, D), lambda i, k: (0, 0), pipeline_mode=single),
                    pl.BlockSpec((1, D), lambda i, k: (0, 0), pipeline_mode=single),
                    pl.BlockSpec((1, D), lambda i, k: (0, 0), pipeline_mode=single),
                ],
                out_specs=pl.BlockSpec((bm, D), lambda i, k: (i, 0)),
                scratch_shapes=[pltpu.VMEM((bm, D), jnp.float32)],
            ),
            compiler_params=pltpu.CompilerParams(
                dimension_semantics=("parallel", "arbitrary"),
                vmem_limit_bytes=vmem_limit,
            ),
        )(x_in, w1, b1r, w2, b2r, gr, br)

    return out[:B] if Bp != B else out


def adapter_reference(x, w1, b1, w2, b2, gamma, beta, eps=1e-5):
    h = jnp.maximum(x @ w1 + b1, 0.0)
    y = h @ w2 + b2
    z = x + y
    mean = jnp.mean(z, axis=-1, keepdims=True)
    var = jnp.mean((z - mean) ** 2, axis=-1, keepdims=True)
    return (z - mean) / jnp.sqrt(var + eps) * gamma + beta


if __name__ == "__main__":
    # Small shapes consistent with the module: batch=16, dim=128, hidden_dim=256
    B, D, H = 16, 128, 256
    key = jax.random.PRNGKey(0)
    kx, k1, kb1, k2, kb2 = jax.random.split(key, 5)

    x = jax.random.normal(kx, (B, D), dtype=jnp.float32)

    # Deterministic PyTorch-style uniform init; weights stored transposed
    # (in_features, out_features).
    bound1 = 1.0 / (D ** 0.5)
    w1 = jax.random.uniform(k1, (D, H), jnp.float32, -bound1, bound1)
    b1 = jax.random.uniform(kb1, (H,), jnp.float32, -bound1, bound1)
    bound2 = 1.0 / (H ** 0.5)
    w2 = jax.random.uniform(k2, (H, D), jnp.float32, -bound2, bound2)
    b2 = jax.random.uniform(kb2, (D,), jnp.float32, -bound2, bound2)
    gamma = jnp.ones((D,), jnp.float32)   # nn.LayerNorm default weight
    beta = jnp.zeros((D,), jnp.float32)   # nn.LayerNorm default bias

    ref = adapter_reference(x, w1, b1, w2, b2, gamma, beta)

    # 1) f32 weights, resident-weights fast path.
    out = jax.block_until_ready(adapter_forward(x, w1, b1, w2, b2, gamma, beta))
    assert out.shape == (B, D)
    assert jnp.allclose(out, ref, atol=1e-4, rtol=1e-4), "resident path mismatch"

    # 2) H-tiled fallback path (forced, to exercise the large-weight code path).
    out_t = jax.block_until_ready(
        adapter_forward(x, w1, b1, w2, b2, gamma, beta,
                        force_h_tiling=True, h_block=128))
    assert jnp.allclose(out_t, ref, atol=1e-4, rtol=1e-4), "H-tiled path mismatch"

    # 3) bf16 weight storage (half the resident VMEM, bf16 MXU path);
    #    activations are down-cast for the matmuls, so compare loosely.
    out_bf = jax.block_until_ready(
        adapter_forward(x, w1.astype(jnp.bfloat16), b1,
                        w2.astype(jnp.bfloat16), b2, gamma, beta))
    assert jnp.allclose(out_bf, ref, atol=1e-1, rtol=1e-1), "bf16 path mismatch"

    print("KERNEL_OK")
</pallas_src>

<mosaic_0001>
module attributes {stable_mosaic.version = 11 : i64} {
  func.func @adapter_kernel(%arg0: i32, %arg1: memref<16x128xf32, #tpu.memory_space<vmem>>, %arg2: memref<128x256xf32, #tpu.memory_space<vmem>>, %arg3: memref<1x256xf32, #tpu.memory_space<vmem>>, %arg4: memref<256x128xf32, #tpu.memory_space<vmem>>, %arg5: memref<1x128xf32, #tpu.memory_space<vmem>>, %arg6: memref<1x128xf32, #tpu.memory_space<vmem>>, %arg7: memref<1x128xf32, #tpu.memory_space<vmem>>, %arg8: memref<16x128xf32, #tpu.memory_space<vmem>>) attributes {dimension_semantics = [#tpu.dimension_semantics<parallel>], iteration_bounds = array<i64: 1>, scalar_prefetch = 0 : i64, scratch_operands = 0 : i64, tpu.core_type = #tpu.core_type<tc>, window_params = [{pipeline_mode = #tpu.pipeline_mode<double_buffered>, transform_indices = @transform_0, window_bounds = array<i64: 16, 128>}, {pipeline_mode = #tpu.pipeline_mode<synchronous>, transform_indices = @transform_1, window_bounds = array<i64: 128, 256>}, {pipeline_mode = #tpu.pipeline_mode<synchronous>, transform_indices = @transform_2, window_bounds = array<i64: 1, 256>}, {pipeline_mode = #tpu.pipeline_mode<synchronous>, transform_indices = @transform_3, window_bounds = array<i64: 256, 128>}, {pipeline_mode = #tpu.pipeline_mode<synchronous>, transform_indices = @transform_4, window_bounds = array<i64: 1, 128>}, {pipeline_mode = #tpu.pipeline_mode<synchronous>, transform_indices = @transform_5, window_bounds = array<i64: 1, 128>}, {pipeline_mode = #tpu.pipeline_mode<synchronous>, transform_indices = @transform_6, window_bounds = array<i64: 1, 128>}, {transform_indices = @transform_7, window_bounds = array<i64: 16, 128>}]} {
    %c0 = arith.constant 0 : index
    %c0_0 = arith.constant 0 : index
    %0 = vector.load %arg1[%c0, %c0_0] : memref<16x128xf32, #tpu.memory_space<vmem>>, vector<16x128xf32>
    %c0_1 = arith.constant 0 : index
    %c0_2 = arith.constant 0 : index
    %1 = vector.load %arg2[%c0_1, %c0_2] : memref<128x256xf32, #tpu.memory_space<vmem>>, vector<128x256xf32>
    %cst = arith.constant dense<0.000000e+00> : vector<16x256xf32>
    %2 = tpu.matmul %0, %1, %cst {dimension_numbers = #tpu.dot_dimension_numbers<[1], [0], [0], [1], [0, 0, 1, 1], [], []>} : vector<16x128xf32>, vector<128x256xf32>, vector<16x256xf32> -> vector<16x256xf32>
    %c0_3 = arith.constant 0 : index
    %c0_4 = arith.constant 0 : index
    %3 = vector.load %arg3[%c0_3, %c0_4] : memref<1x256xf32, #tpu.memory_space<vmem>>, vector<1x256xf32>
    %4 = vector.broadcast %3 : vector<1x256xf32> to vector<16x256xf32>
    %5 = arith.addf %2, %4 : vector<16x256xf32>
    %cst_5 = arith.constant 0.000000e+00 : f32
    %6 = vector.broadcast %cst_5 : f32 to vector<16x256xf32>
    %7 = arith.maximumf %5, %6 : vector<16x256xf32>
    %c0_6 = arith.constant 0 : index
    %c0_7 = arith.constant 0 : index
    %8 = vector.load %arg4[%c0_6, %c0_7] : memref<256x128xf32, #tpu.memory_space<vmem>>, vector<256x128xf32>
    %cst_8 = arith.constant dense<0.000000e+00> : vector<16x128xf32>
    %9 = tpu.matmul %7, %8, %cst_8 {dimension_numbers = #tpu.dot_dimension_numbers<[1], [0], [0], [1], [0, 0, 1, 1], [], []>} : vector<16x256xf32>, vector<256x128xf32>, vector<16x128xf32> -> vector<16x128xf32>
    %c0_9 = arith.constant 0 : index
    %c0_10 = arith.constant 0 : index
    %10 = vector.load %arg5[%c0_9, %c0_10] : memref<1x128xf32, #tpu.memory_space<vmem>>, vector<1x128xf32>
    %11 = vector.broadcast %10 : vector<1x128xf32> to vector<16x128xf32>
    %12 = arith.addf %9, %11 : vector<16x128xf32>
    %13 = arith.addf %0, %12 : vector<16x128xf32>
    %cst_11 = arith.constant dense<0.000000e+00> : vector<16xf32>
    %14 = vector.multi_reduction <add>, %13, %cst_11 [1] : vector<16x128xf32> to vector<16xf32>
    %15 = vector.shape_cast %14 : vector<16xf32> to vector<16x1xf32>
    %cst_12 = arith.constant 1.280000e+02 : f32
    %16 = vector.broadcast %cst_12 : f32 to vector<16x1xf32>
    %17 = arith.divf %15, %16 : vector<16x1xf32>
    %18 = vector.broadcast %17 : vector<16x1xf32> to vector<16x128xf32>
    %19 = arith.subf %13, %18 : vector<16x128xf32>
    %20 = arith.mulf %19, %19 : vector<16x128xf32>
    %cst_13 = arith.constant dense<0.000000e+00> : vector<16xf32>
    %21 = vector.multi_reduction <add>, %20, %cst_13 [1] : vector<16x128xf32> to vector<16xf32>
    %22 = vector.shape_cast %21 : vector<16xf32> to vector<16x1xf32>
    %cst_14 = arith.constant 1.280000e+02 : f32
    %23 = vector.broadcast %cst_14 : f32 to vector<16x1xf32>
    %24 = arith.divf %22, %23 : vector<16x1xf32>
    %cst_15 = arith.constant 9.99999974E-6 : f32
    %25 = vector.broadcast %cst_15 : f32 to vector<16x1xf32>
    %26 = arith.addf %24, %25 : vector<16x1xf32>
    %27 = math.rsqrt %26 : vector<16x1xf32>
    %28 = vector.broadcast %27 : vector<16x1xf32> to vector<16x128xf32>
    %29 = arith.mulf %19, %28 : vector<16x128xf32>
    %c0_16 = arith.constant 0 : index
    %c0_17 = arith.constant 0 : index
    %30 = vector.load %arg6[%c0_16, %c0_17] : memref<1x128xf32, #tpu.memory_space<vmem>>, vector<1x128xf32>
    %31 = vector.broadcast %30 : vector<1x128xf32> to vector<16x128xf32>
    %32 = arith.mulf %29, %31 : vector<16x128xf32>
    %c0_18 = arith.constant 0 : index
    %c0_19 = arith.constant 0 : index
    %33 = vector.load %arg7[%c0_18, %c0_19] : memref<1x128xf32, #tpu.memory_space<vmem>>, vector<1x128xf32>
    %34 = vector.broadcast %33 : vector<1x128xf32> to vector<16x128xf32>
    %35 = arith.addf %32, %34 : vector<16x128xf32>
    %c0_20 = arith.constant 0 : index
    %c0_21 = arith.constant 0 : index
    %36 = vector.load %arg8[%c0_20, %c0_21] : memref<16x128xf32, #tpu.memory_space<vmem>>, vector<16x128xf32>
    tpu.vector_store %arg8[%c0_20, %c0_21], %35 {strides = array<i32>} : memref<16x128xf32, #tpu.memory_space<vmem>>, vector<16x128xf32>,
    return
  }
  func.func @transform_0(%arg0: i32) -> (i32, i32) {
    %c0_i32 = arith.constant 0 : i32
    %c0_i32_0 = arith.constant 0 : i32
    return %arg0, %c0_i32 : i32, i32
  }
  func.func @transform_1(%arg0: i32) -> (i32, i32) {
    %c0_i32 = arith.constant 0 : i32
    %c0_i32_0 = arith.constant 0 : i32
    %c0_i32_1 = arith.constant 0 : i32
    return %c0_i32, %c0_i32_0 : i32, i32
  }
  func.func @transform_2(%arg0: i32) -> (i32, i32) {
    %c0_i32 = arith.constant 0 : i32
    %c0_i32_0 = arith.constant 0 : i32
    %c0_i32_1 = arith.constant 0 : i32
    return %c0_i32, %c0_i32_0 : i32, i32
  }
  func.func @transform_3(%arg0: i32) -> (i32, i32) {
    %c0_i32 = arith.constant 0 : i32
    %c0_i32_0 = arith.constant 0 : i32
    %c0_i32_1 = arith.constant 0 : i32
    return %c0_i32, %c0_i32_0 : i32, i32
  }
  func.func @transform_4(%arg0: i32) -> (i32, i32) {
    %c0_i32 = arith.constant 0 : i32
    %c0_i32_0 = arith.constant 0 : i32
    %c0_i32_1 = arith.constant 0 : i32
    return %c0_i32, %c0_i32_0 : i32, i32
  }
  func.func @transform_5(%arg0: i32) -> (i32, i32) {
    %c0_i32 = arith.constant 0 : i32
    %c0_i32_0 = arith.constant 0 : i32
    %c0_i32_1 = arith.constant 0 : i32
    return %c0_i32, %c0_i32_0 : i32, i32
  }
  func.func @transform_6(%arg0: i32) -> (i32, i32) {
    %c0_i32 = arith.constant 0 : i32
    %c0_i32_0 = arith.constant 0 : i32
    %c0_i32_1 = arith.constant 0 : i32
    return %c0_i32, %c0_i32_0 : i32, i32
  }
  func.func @transform_7(%arg0: i32) -> (i32, i32) {
    %c0_i32 = arith.constant 0 : i32
    %c0_i32_0 = arith.constant 0 : i32
    return %arg0, %c0_i32 : i32, i32
  }
}

</mosaic_0001>

<bundles_post_ra>
// kernel: tpu_custom_call.1
= control target key start
LH: loop header
LB: loop body
LE: loop exit
PB: predicated region body
PF: predicated region fallthrough
CT: control target
= control target key end

     0   :  { %12 = vsyncpa [#allocation3], 0  ;;  %s574_s0 = inlined_call_operand.hbm [shape: f32[16,128], index: 0, kind: input, shape index: {}]   ;;  %s575_s1 = inlined_call_operand.hbm [shape: f32[128,256], index: 1, kind: input, shape index: {}]   ;;  %s576_s2 = inlined_call_operand.hbm [shape: f32[1,256], index: 2, kind: input, shape index: {}]   ;;  %s577_s3 = inlined_call_operand.hbm [shape: f32[256,128], index: 3, kind: input, shape index: {}]   ;;  %s578_s4 = inlined_call_operand.vmem [shape: f32[1,128], index: 4, kind: input, shape index: {}]   ;;  %s579_s5 = inlined_call_operand.vmem [shape: f32[1,128], index: 5, kind: input, shape index: {}]   ;;  %s580_s6 = inlined_call_operand.vmem [shape: f32[1,128], index: 6, kind: input, shape index: {}]   ;;  %s581_s7 = inlined_call_operand.hbm [shape: f32[16,128], index: 7, kind: output, shape index: {}]  }
   0x1   :  { %13 = vsyncpa [#allocation6], 0 }
   0x2   :  { %14 = vsyncpa [#allocation9], 0  ;;  %s33_s26 = sshll.u32 %s575_s1, 4  ;;  %s34_s26 = int_to_ptr.hbm [resolvable:$true] %s33_s26 }
   0x3   :  { %15 = vsyncpa [#allocation4], 0  ;;  %s491_s27 = smov [#allocation5]   ;;  %s20_s8 = sshll.u32 %s574_s0, 4  ;;  %s21_s8 = int_to_ptr.hbm [resolvable:$true] %s20_s8 }
   0x4   :  { %s35_s28 = sshll.u32 %s491_s27, 4  ;;  %s492_s9 = smov 256   ;;  %s36_s28 = int_to_ptr.vmem [resolvable:$true] %s35_s28 }
   0x5   :  { %s493_s10 = smov 16   ;;  %s494_s11 = smov [#allocation2]  }
   0x6   :  { %41 = dma.hbm_to_vmem [thread:$0]  %s34_s26, 4096, %s36_s28, [#allocation6], %s492_s9, %s492_s9, %s493_s10  }
   0x7   :  { %s22_s12 = sshll.u32 %s494_s11, 4  ;;  %s495_s13 = smov 128   ;;  %s23_s12 = int_to_ptr.vmem [resolvable:$true] %s22_s12 }
   0x8   :  { %s496_s14 = smov 8   ;;  %s47_s16 = sshll.u32 %s576_s2, 4  ;;  %s48_s16 = int_to_ptr.hbm [resolvable:$true] %s47_s16 }
   0x9   :  { %28 = dma.hbm_to_vmem [thread:$0]  %s21_s8, 256, %s23_s12, [#allocation3], %s495_s13, %s495_s13, %s496_s14  }
   0xa   :  { %s497_s17 = smov [#allocation7]   ;;  %s57_s20 = sshll.u32 %s577_s3, 4  ;;  %s58_s20 = int_to_ptr.hbm [resolvable:$true] %s57_s20 }
   0xb   :  { %s49_s0 = sshll.u32 %s497_s17, 4  ;;  %s498_s21 = smov [#allocation8]   ;;  %s50_s0 = int_to_ptr.vmem [resolvable:$true] %s49_s0 }
   0xc   :  { %52 = dma.hbm_to_vmem [thread:$0]  %s48_s16, 32, %s50_s0, [#allocation6]  }
   0xd   :  { %s59_s22 = sshll.u32 %s498_s21, 4  ;;  %s60_s22 = int_to_ptr.vmem [resolvable:$true] %s59_s22 }
   0xe   :  { %65 = dma.hbm_to_vmem [thread:$0]  %s58_s20, 4096, %s60_s22, [#allocation9], %s495_s13, %s495_s13, %s496_s14  }
   0xf   :  { %483 = dma.done.wait [#allocation3], 256  }
  0x10   :  { %484 = vsyncadd [#allocation3], 4294967040 }
  0x11   :  { %485 = dma.done.wait [#allocation6], 4128  }
  0x12   :  { %486 = vsyncadd [#allocation6], 4294963168 }
  0x13   :  { %487 = dma.done.wait [#allocation9], 4096  }
  0x14   :  { %488 = vsyncadd [#allocation9], 4294963200  ;;  %v120_v0 = vld [vmem:[#allocation5 + $0xf0] sm:$0xff]  ;;  %v118_v1 = vld [vmem:[#allocation5 + $0xe0] sm:$0xff]  ;;  %s500_s26 = smov [#allocation10]   ;;  %s329_s29 = sshll.u32 %s581_s7, 4  ;;  %s330_s29 = int_to_ptr.hbm [resolvable:$true] %s329_s29 }
  0x15   :  { %v121_v2 = vld [vmem:[#allocation5 + $0xf8] sm:$0xff]  ;;  %128 = vmatpush.msra.mxu0 %v120_v0  ;;  %v119_v3 = vld [vmem:[#allocation5 + $0xe8] sm:$0xff]  ;;  %v116_v4 = vld [vmem:[#allocation5 + $0xd0] sm:$0xff] }
  0x16   :  { %151 = vmatpush.msra.mxu1 %v121_v2  ;;  %v117_v5 = vld [vmem:[#allocation5 + $0xd8] sm:$0xff]  ;;  %v114_v6 = vld [vmem:[#allocation5 + $0xc0] sm:$0xff]  ;;  %v115_v7 = vld [vmem:[#allocation5 + $0xc8] sm:$0xff] }
  0x17   :  { %129 = vmatpush.msra.mxu0 %v118_v1  ;;  %v112_v8 = vld [vmem:[#allocation5 + $0xb0] sm:$0xff]  ;;  %v113_v9 = vld [vmem:[#allocation5 + $0xb8] sm:$0xff]  ;;  %v110_v10 = vld [vmem:[#allocation5 + $0xa0] sm:$0xff] }
  0x18   :  { %152 = vmatpush.msra.mxu1 %v119_v3  ;;  %v111_v11 = vld [vmem:[#allocation5 + $0xa8] sm:$0xff]  ;;  %v108_v12 = vld [vmem:[#allocation5 + $0x90] sm:$0xff]  ;;  %v109_v13 = vld [vmem:[#allocation5 + $0x98] sm:$0xff] }
  0x19   :  { %130 = vmatpush.msra.mxu0 %v116_v4  ;;  %v193_v14 = vld [vmem:[#allocation8 + $0x78] sm:$0xff]  ;;  %v192_v15 = vld [vmem:[#allocation8 + $0x70] sm:$0xff]  ;;  %v107_v17 = vld [vmem:[#allocation5 + $0x88] sm:$0xff] }
  0x1a   :  { %153 = vmatpush.msra.mxu1 %v117_v5  ;;  %v106_v16 = vld [vmem:[#allocation5 + $0x80] sm:$0xff]  ;;  %214 = vmatpush.msra.mxu2 %v193_v14  ;;  %v191_v19 = vld [vmem:[#allocation8 + $0x68] sm:$0xff]  ;;  %v208_v20 = vld [vmem:[#allocation8 + $0xf0] sm:$0xff] }
  0x1b   :  { %131 = vmatpush.msra.mxu0 %v114_v6  ;;  %v209_v18 = vld [vmem:[#allocation8 + $0xf8] sm:$0xff]  ;;  %v104_v21 = vld [vmem:[#allocation5 + $0x70] sm:$0xff]  ;;  %v190_v23 = vld [vmem:[#allocation8 + $0x60] sm:$0xff] }
  0x1c   :  { %154 = vmatpush.msra.mxu1 %v115_v7  ;;  %v105_v22 = vld [vmem:[#allocation5 + $0x78] sm:$0xff]  ;;  %215 = vmatpush.msra.mxu2 %v192_v15  ;;  %v207_v24 = vld [vmem:[#allocation8 + $0xe8] sm:$0xff]  ;;  %v102_v25 = vld [vmem:[#allocation5 + $0x60] sm:$0xff] }
  0x1d   :  { %132 = vmatpush.msra.mxu0 %v112_v8  ;;  %237 = vmatpush.msra.mxu3 %v209_v18  ;;  %v103_v26 = vld [vmem:[#allocation5 + $0x68] sm:$0xff]  ;;  %v189_v27 = vld [vmem:[#allocation8 + $0x58] sm:$0xff]  ;;  %v100_v29 = vld [vmem:[#allocation5 + $0x50] sm:$0xff] }
  0x1e   :  { %155 = vmatpush.msra.mxu1 %v113_v9  ;;  %216 = vmatpush.msra.mxu2 %v191_v19  ;;  %v206_v28 = vld [vmem:[#allocation8 + $0xe0] sm:$0xff]  ;;  %v101_v30 = vld [vmem:[#allocation5 + $0x58] sm:$0xff]  ;;  %v187_v35 = vld [vmem:[#allocation8 + $0x48] sm:$0xff] }
  0x1f   :  { %133 = vmatpush.msra.mxu0 %v110_v10  ;;  %238 = vmatpush.msra.mxu3 %v208_v20  ;;  %v98_v31 = vld [vmem:[#allocation5 + $0x40] sm:$0xff]  ;;  %v188_v32 = vld [vmem:[#allocation8 + $0x50] sm:$0xff]  ;;  %v99_v34 = vld [vmem:[#allocation5 + $0x48] sm:$0xff] }
  0x20   :  { %156 = vmatpush.msra.mxu1 %v111_v11  ;;  %217 = vmatpush.msra.mxu2 %v190_v23  ;;  %v205_v33 = vld [vmem:[#allocation8 + $0xd8] sm:$0xff]  ;;  %v204_v36 = vld [vmem:[#allocation8 + $0xd0] sm:$0xff]  ;;  %v186_v39 = vld [vmem:[#allocation8 + $0x40] sm:$0xff] }
  0x21   :  { %134 = vmatpush.msra.mxu0 %v108_v12  ;;  %239 = vmatpush.msra.mxu3 %v207_v24  ;;  %v96_v37 = vld [vmem:[#allocation5 + $0x30] sm:$0xff]  ;;  %v97_v38 = vld [vmem:[#allocation5 + $0x38] sm:$0xff]  ;;  %v94_v41 = vld [vmem:[#allocation5 + $0x20] sm:$0xff] }
  0x22   :  { %157 = vmatpush.msra.mxu1 %v109_v13  ;;  %218 = vmatpush.msra.mxu2 %v189_v27  ;;  %v203_v40 = vld [vmem:[#allocation8 + $0xc8] sm:$0xff]  ;;  %v185_v43 = vld [vmem:[#allocation8 + $0x38] sm:$0xff]  ;;  %v202_v44 = vld [vmem:[#allocation8 + $0xc0] sm:$0xff] }
  0x23   :  { %135 = vmatpush.msra.mxu0 %v106_v16  ;;  %240 = vmatpush.msra.mxu3 %v206_v28  ;;  %v95_v42 = vld [vmem:[#allocation5 + $0x28] sm:$0xff]  ;;  %v92_v45 = vld [vmem:[#allocation5 + $0x10] sm:$0xff]  ;;  %v93_v46 = vld [vmem:[#allocation5 + $0x18] sm:$0xff]  ;;  %v499_v28 = vmov 128.0  }
  0x24   :  { %158 = vmatpush.msra.mxu1 %v107_v17  ;;  %219 = vmatpush.msra.mxu2 %v188_v32  ;;  %v184_v47 = vld [vmem:[#allocation8 + $0x30] sm:$0xff]  ;;  %v201_v48 = vld [vmem:[#allocation8 + $0xb8] sm:$0xff]  ;;  %v91_v50 = vld [vmem:[#allocation5 + $0x8] sm:$0xff]  ;;  %357 = vrcp.f32 %v499_v28 }
  0x25   :  { %136 = vmatpush.msra.mxu0 %v104_v21  ;;  %241 = vmatpush.msra.mxu3 %v205_v33  ;;  %v90_v49 = vld [vmem:[#allocation5] sm:$0xff]  ;;  %v88_v51 = vld [vmem:[#allocation2] sm:$0xff]  ;;  %v89_v58 = vld [vmem:[#allocation2 + $0x8] sm:$0xff] }
  0x26   :  { %159 = vmatpush.msra.mxu1 %v105_v22  ;;  %220 = vmatpush.msra.mxu2 %v187_v35  ;;  %v183_v52 = vld [vmem:[#allocation8 + $0x28] sm:$0xff]  ;;  %v200_v53 = vld [vmem:[#allocation8 + $0xb0] sm:$0xff]  ;;  %v182_v54 = vld [vmem:[#allocation8 + $0x20] sm:$0xff] }
  0x27   :  { %137 = vmatpush.msra.mxu0 %v102_v25  ;;  %242 = vmatpush.msra.mxu3 %v204_v36  ;;  %v199_v55 = vld [vmem:[#allocation8 + $0xa8] sm:$0xff]  ;;  %v181_v56 = vld [vmem:[#allocation8 + $0x18] sm:$0xff]  ;;  %v198_v57 = vld [vmem:[#allocation8 + $0xa0] sm:$0xff] }
  0x28   :  { %160 = vmatpush.msra.mxu1 %v103_v26  ;;  %221 = vmatpush.msra.mxu2 %v186_v39  ;;  %v180_v59 = vld [vmem:[#allocation8 + $0x10] sm:$0xff]  ;;  %v197_v60 = vld [vmem:[#allocation8 + $0x98] sm:$0xff]  ;;  %v179_v61 = vld [vmem:[#allocation8 + $0x8] sm:$0xff] }
  0x29   :  { %138 = vmatpush.msra.mxu0 %v100_v29  ;;  %243 = vmatpush.msra.mxu3 %v203_v40  ;;  %v196_v62 = vld [vmem:[#allocation8 + $0x90] sm:$0xff]  ;;  %v178_v63 = vld [vmem:[#allocation8] sm:$0xff]  ;;  %v195_v0 = vld [vmem:[#allocation8 + $0x88] sm:$0xff] }
  0x2a   :  { %161 = vmatpush.msra.mxu1 %v101_v30  ;;  %222 = vmatpush.msra.mxu2 %v185_v43  ;;  %v194_v1 = vld [vmem:[#allocation8 + $0x80] sm:$0xff]  ;;  %v122_v2 = vld [vmem:[#allocation7] sm:$0x3]  ;;  %v354_v17 = vld [vmem:[%s578_s4] ss:$0 sm:$0xff]  ;;  %v358_v29 = vpop.eup %357 }
  0x2b   :  { %139 = vmatpush.msra.mxu0 %v98_v31  ;;  %244 = vmatpush.msra.mxu3 %v202_v44  ;;  %v124_v3 = vperm.slane %v122_v2, 0  ;;  %v125_v4 = vperm.slane %v122_v2, 1  ;;  %v267_v30 = vmul.f32 128.0, %v358_v29  ;;  %vm271_vm0 = vweird.f32 %v358_v29 }
  0x2c   :  { %162 = vmatpush.msra.mxu1 %v99_v34  ;;  %223 = vmatpush.msra.mxu2 %v184_v47 }
  0x2d   :  { %140 = vmatpush.msra.mxu0 %v96_v37  ;;  %245 = vmatpush.msra.mxu3 %v201_v48  ;;  %v268_v31 = vsub.f32 1.0, %v267_v30 }
  0x2e   :  { %163 = vmatpush.msra.mxu1 %v97_v38  ;;  %224 = vmatpush.msra.mxu2 %v183_v52 }
  0x2f   :  { %141 = vmatpush.msra.mxu0 %v94_v41  ;;  %246 = vmatpush.msra.mxu3 %v200_v53  ;;  %v269_v32 = vmul.f32 %v358_v29, %v268_v31 }
  0x30   :  { %164 = vmatpush.msra.mxu1 %v95_v42  ;;  %225 = vmatpush.msra.mxu2 %v182_v54 }
  0x31   :  { %142 = vmatpush.msra.mxu0 %v92_v45  ;;  %247 = vmatpush.msra.mxu3 %v199_v55  ;;  %v270_v33 = vadd.f32 %v358_v29, %v269_v32 }
  0x32   :  { %165 = vmatpush.msra.mxu1 %v93_v46  ;;  %226 = vmatpush.msra.mxu2 %v181_v56 }
  0x33   :  { %143 = vmatpush.msra.mxu0 %v90_v49  ;;  %248 = vmatpush.msra.mxu3 %v198_v57  ;;  %v272_v34 = vsel %vm271_vm0, %v358_v29, %v270_v33  ;;  %v355_v57 = vld [vmem:[%s579_s5] ss:$0 sm:$0xff]  ;;  %s327_s5 = sshll.u32 %s500_s26, 4  ;;  %s328_s5 = int_to_ptr.vmem [resolvable:$true] %s327_s5 }
  0x34   :  { %166 = vmatpush.msra.mxu1 %v91_v50  ;;  %144 = vmatmul.f32.vlgmr.msra.gmra.mxu0 %v88_v51 }
  0x35   :  { %167 = vmatmul.f32.vlgmr.msra.gmra.mxu1 %v88_v51  ;;  %227 = vmatpush.msra.mxu2 %v180_v59 }
  0x36   :  { %249 = vmatpush.msra.mxu3 %v197_v60 }
  0x37   :  { %228 = vmatpush.msra.mxu2 %v179_v61  ;;  %v356_v61 = vld [vmem:[%s580_s6] ss:$0 sm:$0xff] }
  0x38   :  { %250 = vmatpush.msra.mxu3 %v196_v62 }
  0x39   :  { %229 = vmatpush.msra.mxu2 %v178_v63 }
  0x3a   :  { %251 = vmatpush.msra.mxu3 %v195_v0 }
  0x3c   :  { %147 = vmatmul.f32.gmra.mxu0 %v89_v58  ;;  %252 = vmatpush.msra.mxu3 %v194_v1 }
  0x3d   :  { %170 = vmatmul.f32.gmra.mxu1 %v89_v58 }
  0xb1   :  { %v145_v5 = vpop.f32.mrf.mxu0 }
  0xb2   :  { %v168_v6 = vpop.f32.mrf.mxu1  ;;  %v146_v7 = vadd.f32 %v145_v5, %v124_v3 }
  0xb3   :  { %v169_v8 = vadd.f32 %v168_v6, %v125_v4 }
  0xb4   :  { %v174_v9 = vmax.f32 %v146_v7, 0.0 }
  0xb5   :  { %v175_v10 = vmax.f32 %v169_v8, 0.0 }
  0xb6   :  { %230 = vmatmul.f32.vlgmr.msra.gmra.mxu2 %v174_v9 }
  0xb7   :  { %253 = vmatmul.f32.vlgmr.msra.gmra.mxu3 %v175_v10 }
  0xb9   :  { %v148_v11 = vpop.f32.mrf.mxu0 }
  0xba   :  { %v171_v12 = vpop.f32.mrf.mxu1  ;;  %v149_v13 = vadd.f32 %v148_v11, %v124_v3 }
  0xbb   :  { %v172_v14 = vadd.f32 %v171_v12, %v125_v4 }
  0xbc   :  { %v176_v15 = vmax.f32 %v149_v13, 0.0 }
  0xbd   :  { %v177_v16 = vmax.f32 %v172_v14, 0.0 }
  0xbe   :  { %233 = vmatmul.f32.gmra.mxu2 %v176_v15 }
  0xbf   :  { %256 = vmatmul.f32.gmra.mxu3 %v177_v16 }
 0x139   :  { %v231_v18 = vpop.f32.mrf.mxu2 }
 0x13a   :  { %v254_v19 = vpop.f32.mrf.mxu3  ;;  %v232_v20 = vadd.f32 %v354_v17, %v231_v18 }
 0x13c   :  { %v255_v21 = vadd.f32 %v254_v19, %v232_v20 }
 0x13e   :  { %v260_v22 = vadd.f32 %v255_v21, %v88_v51 }
 0x140   :  { %262 = vadd.xlane.f32.xlu0 %v260_v22 }
 0x141   :  { %v234_v23 = vpop.f32.mrf.mxu2 }
 0x142   :  { %v257_v24 = vpop.f32.mrf.mxu3  ;;  %v235_v25 = vadd.f32 %v354_v17, %v234_v23 }
 0x144   :  { %v258_v26 = vadd.f32 %v257_v24, %v235_v25 }
 0x146   :  { %v261_v27 = vadd.f32 %v258_v26, %v89_v58 }
 0x148   :  { %264 = vadd.xlane.f32.xlu0 %v261_v27 }
 0x1b3   :  { %v263_v35 = vpop.xlane.xlu0 %262 }
 0x1b4   :  { %v273_v36 = vmul.f32 %v272_v34, %v263_v35 }
 0x1b6   :  { %v275_v37 = vsub.f32 %v260_v22, %v273_v36 }
 0x1b8   :  { %v277_v38 = vmul.f32 %v275_v37, %v275_v37 }
 0x1ba   :  { %279 = vadd.xlane.f32.xlu1 %v277_v38 }
 0x1bb   :  { %v265_v39 = vpop.xlane.xlu0 %264 }
 0x1bc   :  { %v274_v40 = vmul.f32 %v272_v34, %v265_v39 }
 0x1be   :  { %v276_v41 = vsub.f32 %v261_v27, %v274_v40 }
 0x1c0   :  { %v278_v42 = vmul.f32 %v276_v41, %v276_v41 }
 0x1c2   :  { %281 = vadd.xlane.f32.xlu1 %v278_v42 }
 0x22d   :  { %v280_v43 = vpop.xlane.xlu1 %279 }
 0x22e   :  { %v283_v44 = vmul.f32 %v280_v43, %v272_v34 }
 0x230   :  { %v285_v45 = vadd.f32 1e-05, %v283_v44 }
 0x232   :  { %359 = vrsqrt.f32 %v285_v45  ;;  %vm293_vm2 = vweird.f32 %v285_v45 }
 0x235   :  { %v282_v46 = vpop.xlane.xlu1 %281 }
 0x236   :  { %v284_v47 = vmul.f32 %v282_v46, %v272_v34 }
 0x238   :  { %v360_v48 = vpop.eup %359  ;;  %v286_v49 = vadd.f32 1e-05, %v284_v47 }
 0x239   :  { %v288_v50 = vmul.f32 %v360_v48, %v285_v45  ;;  %vm294_vm1 = vweird.f32 %v360_v48 }
 0x23a   :  { %361 = vrsqrt.f32 %v286_v49  ;;  %vm295_vm3 = vmor %vm293_vm2, %vm294_vm1  ;;  %vm303_vm5 = vweird.f32 %v286_v49 }
 0x23b   :  { %v289_v51 = vmul.f32 %v360_v48, %v288_v50 }
 0x23d   :  { %v290_v52 = vmul.f32 0.5, %v289_v51 }
 0x23f   :  { %v291_v53 = vsub.f32 1.5, %v290_v52 }
 0x240   :  { %v362_v54 = vpop.eup %361 }
 0x241   :  { %v292_v55 = vmul.f32 %v360_v48, %v291_v53  ;;  %v298_v56 = vmul.f32 %v362_v54, %v286_v49  ;;  %vm304_vm4 = vweird.f32 %v362_v54 }
 0x242   :  { %vm305_vm6 = vmor %vm303_vm5, %vm304_vm4 }
 0x243   :  { %v296_v58 = vsel %vm295_vm3, %v360_v48, %v292_v55  ;;  %v299_v59 = vmul.f32 %v362_v54, %v298_v56 }
 0x244   :  { %v307_v60 = vmul.f32 %v296_v58, %v275_v37 }
 0x245   :  { %v300_v62 = vmul.f32 0.5, %v299_v59 }
 0x246   :  { %v313_v63 = vmul.f32 %v355_v57, %v307_v60 }
 0x247   :  { %v301_v0 = vsub.f32 1.5, %v300_v62 }
 0x248   :  { %v319_v1 = vadd.f32 %v356_v61, %v313_v63 }
 0x249   :  { %v302_v2 = vmul.f32 %v362_v54, %v301_v0 }
 0x24a   :  { %321 = vst [vmem:[#allocation10] sm:$0xff] %v319_v1 }
 0x24b   :  { %v306_v3 = vsel %vm305_vm6, %v362_v54, %v302_v2 }
 0x24c   :  { %v308_v4 = vmul.f32 %v306_v3, %v276_v41 }
 0x24e   :  { %v314_v5 = vmul.f32 %v355_v57, %v308_v4 }
 0x250   :  { %v320_v6 = vadd.f32 %v356_v61, %v314_v5 }
 0x252   :  { %322 = vst [vmem:[#allocation10 + $0x8] sm:$0xff] %v320_v6 }
 0x253   :  { %335 = dma.vmem_to_hbm [thread:$0]  %s328_s5, 256, %s330_s29, [#allocation4], %s495_s13, %s495_s13, %s496_s14  }
 0x254   :  { %489 = dma.done.wait [#allocation4], 256  }
 0x255   :  { %490 = vsyncadd [#allocation4], 4294967040 }
 0x256   :  { %340 = vsyncpa [#allocation3], 1 }
 0x257   :  { %341 = vsyncpa [#allocation6], 1 }
 0x258   :  { %342 = vsyncpa [#allocation9], 1 }
 0x259   :  { %343 = vsyncpa [#allocation4], 1 }

</bundles_post_ra>
